<compile_context>
chip_gen: v7x
topology: tpu7x:2x2x1
jax: 0.10.0
libtpu: 0.0.40
codegen_flags: <defaults>
</compile_context>

<pallas_src>
import functools

import jax
import jax.numpy as jnp
from jax import lax
from jax.experimental import pallas as pl
from jax.experimental.pallas import tpu as pltpu


def _round_up(x, m):
    return ((x + m - 1) // m) * m


# ----------------------------------------------------------------------------
# Kernel: grid = (num_iter, num_row_tiles)
# ----------------------------------------------------------------------------
def _cluster_kernel(beta_ref, data_ref, init_ref, mu_ref, r_ref,
                    mu_sc, mean_sc, cnt_sc, *, n_rows, block_rows):
    it = pl.program_id(0)            # k-means iteration
    i = pl.program_id(1)             # row tile within this iteration
    n_it = pl.num_programs(0)
    n_tiles = pl.num_programs(1)
    eps = 1e-8

    # Very first grid step: seed mu from the (VMEM-resident) init block.
    @pl.when(jnp.logical_and(it == 0, i == 0))
    def _():
        mu_sc[...] = init_ref[...]

    # Start of every k-means iteration: zero the statistics accumulators.
    @pl.when(i == 0)
    def _():
        mean_sc[...] = jnp.zeros_like(mean_sc)
        cnt_sc[...] = jnp.zeros_like(cnt_sc)

    beta = beta_ref[0, 0]

    data = data_ref[...]                                        # (tm, n_h)
    d_abs = jnp.sqrt(jnp.sum(data * data, axis=1, keepdims=True))
    d_norm = data / jnp.maximum(d_abs, eps)

    mu = mu_sc[...]                                             # (K, n_h)
    mu_abs = jnp.sqrt(jnp.sum(mu * mu, axis=1, keepdims=True))
    mu_norm = mu / jnp.maximum(mu_abs, eps)

    # Cosine similarity: contract feature dims directly (no transposes).
    dist = lax.dot_general(d_norm, mu_norm, (((1,), (1,)), ((), ())),
                           preferred_element_type=jnp.float32)   # (tm, K)
    logits = beta * dist
    logits = logits - jnp.max(logits, axis=1, keepdims=True)     # stable softmax
    e = jnp.exp(logits)
    r = e / jnp.sum(e, axis=1, keepdims=True)                    # softmax over K

    # Mask zero-padded rows (only the last tile can contain any).
    row_ids = lax.broadcasted_iota(jnp.int32, (block_rows, 1), 0) + i * block_rows
    r = jnp.where(row_ids < n_rows, r, 0.0)

    r_ref[...] = r   # r of the *current* mu; final iteration's r is returned

    # Accumulate r^T @ data and per-cluster responsibility mass.  Both use
    # dot_general contracting the row axis -> no per-iteration transposes.
    mean_sc[...] += lax.dot_general(r, data, (((0,), (0,)), ((), ())),
                                    preferred_element_type=jnp.float32)  # (K, n_h)
    ones_col = jnp.ones((block_rows, 1), jnp.float32)
    cnt_sc[...] += lax.dot_general(r, ones_col, (((0,), (0,)), ((), ())),
                                   preferred_element_type=jnp.float32)   # (K, 1)

    # End of a k-means iteration: mu <- diag(1/cluster_r) @ cluster_mean.
    # (Reference has no epsilon here; softmax keeps cluster_r strictly > 0.)
    @pl.when(i == n_tiles - 1)
    def _():
        mu_sc[...] = mean_sc[...] / cnt_sc[...]

    # Final grid step: emit the updated mu (matches reference return order:
    # mu is post-final-update, r is from the mu *before* the final update).
    @pl.when(jnp.logical_and(it == n_it - 1, i == n_tiles - 1))
    def _():
        mu_ref[...] = mean_sc[...] / cnt_sc[...]


# ----------------------------------------------------------------------------
# Wrapper: Clusterator.forward(embeds, beta, num_iter) -> (mu, r)
# ----------------------------------------------------------------------------
def clusterator_forward(embeds, init, beta, *, num_iter=11, block_rows=256):
    embeds = jnp.asarray(embeds, jnp.float32)
    init = jnp.asarray(init, jnp.float32)
    n, n_h = embeds.shape
    K = init.shape[0]

    tm = min(block_rows, _round_up(n, 8))     # row tile, multiple of 8 sublanes
    n_pad = _round_up(n, tm)
    n_tiles = n_pad // tm
    if n_pad != n:
        embeds_p = jnp.zeros((n_pad, n_h), jnp.float32).at[:n].set(embeds)
    else:
        embeds_p = embeds

    beta_arr = jnp.full((1, 1), beta, jnp.float32)

    kernel = functools.partial(_cluster_kernel, n_rows=n, block_rows=tm)

    mu, r_pad = pl.pallas_call(
        kernel,
        out_shape=(jax.ShapeDtypeStruct((K, n_h), jnp.float32),      # mu
                   jax.ShapeDtypeStruct((n_pad, K), jnp.float32)),   # r (padded)
        grid_spec=pltpu.PrefetchScalarGridSpec(
            num_scalar_prefetch=0,
            grid=(num_iter, n_tiles),
            in_specs=[
                pl.BlockSpec(memory_space=pltpu.MemorySpace.SMEM),    # beta scalar
                pl.BlockSpec((tm, n_h), lambda it, i: (i, 0)),        # embeds tiles
                pl.BlockSpec((K, n_h), lambda it, i: (0, 0)),         # init (resident)
            ],
            out_specs=(
                pl.BlockSpec((K, n_h), lambda it, i: (0, 0)),         # mu (resident)
                pl.BlockSpec((tm, K), lambda it, i: (i, 0)),          # r tiles
            ),
            scratch_shapes=[
                pltpu.VMEM((K, n_h), jnp.float32),   # mu carried across grid steps
                pltpu.VMEM((K, n_h), jnp.float32),   # sum_n r_nk * x_n accumulator
                pltpu.VMEM((K, 1), jnp.float32),     # sum_n r_nk accumulator
            ]),
        compiler_params=pltpu.CompilerParams(
            # both axes carry sequential state (iteration carry / row reduction)
            dimension_semantics=("arbitrary", "arbitrary")),
    )(beta_arr, embeds_p, init)

    return mu, r_pad[:n]


class Clusterator:
    """JAX/Pallas port of the PyTorch Clusterator module."""

    def __init__(self, key, n_h, K):
        self.K = K
        self.n_h = n_h
        # torch.rand(K, n_h) -> uniform [0, 1)
        self.init = jax.random.uniform(key, (K, n_h), dtype=jnp.float32)

    def __call__(self, embeds, beta, num_iter=11, block_rows=256):
        return clusterator_forward(embeds, self.init, beta,
                                   num_iter=num_iter, block_rows=block_rows)


# ----------------------------------------------------------------------------
# Pure-JAX reference (mirrors the PyTorch `cluster` function) for validation.
# ----------------------------------------------------------------------------
def _cluster_reference(data, init, beta, num_iter):
    eps = 1e-8
    mu = init
    d_abs = jnp.sqrt(jnp.sum(data * data, axis=1, keepdims=True))
    d_norm = data / jnp.maximum(d_abs, eps)
    r = None
    for _ in range(num_iter):
        m_abs = jnp.sqrt(jnp.sum(mu * mu, axis=1, keepdims=True))
        m_norm = mu / jnp.maximum(m_abs, eps)
        dist = d_norm @ m_norm.T
        r = jax.nn.softmax(beta * dist, axis=1)
        cluster_r = jnp.sum(r, axis=0)
        cluster_mean = r.T @ data
        mu = cluster_mean / cluster_r[:, None]
    return mu, r


if __name__ == "__main__":
    n, n_h, K = 200, 32, 4          # small shapes; n deliberately not tile-aligned
    beta = 10.0
    num_iter = 11

    key = jax.random.PRNGKey(0)
    k_init, k_data = jax.random.split(key)

    model = Clusterator(k_init, n_h, K)
    embeds = jax.random.normal(k_data, (n, n_h), jnp.float32)

    # block_rows=64 -> 4 row tiles + 56 masked padding rows (exercises tiling path)
    mu, r = model(embeds, beta, num_iter=num_iter, block_rows=64)
    jax.block_until_ready((mu, r))

    assert mu.shape == (K, n_h) and r.shape == (n, K)
    assert bool(jnp.all(jnp.isfinite(mu))) and bool(jnp.all(jnp.isfinite(r)))

    mu_ref, r_ref = _cluster_reference(embeds, model.init, beta, num_iter)
    assert bool(jnp.allclose(mu, mu_ref, rtol=1e-3, atol=1e-3)), \
        float(jnp.max(jnp.abs(mu - mu_ref)))
    assert bool(jnp.allclose(r, r_ref, rtol=1e-3, atol=1e-3)), \
        float(jnp.max(jnp.abs(r - r_ref)))

    print("KERNEL_OK")
</pallas_src>

<mosaic_0001>
module attributes {stable_mosaic.version = 11 : i64} {
  func.func @_cluster_kernel(%arg0: i32, %arg1: i32, %arg2: memref<1x1xf32, #tpu.memory_space<smem>>, %arg3: memref<64x32xf32, #tpu.memory_space<vmem>>, %arg4: memref<4x32xf32, #tpu.memory_space<vmem>>, %arg5: memref<4x32xf32, #tpu.memory_space<vmem>>, %arg6: memref<64x4xf32, #tpu.memory_space<vmem>>, %arg7: memref<4x32xf32, #tpu.memory_space<vmem>>, %arg8: memref<4x32xf32, #tpu.memory_space<vmem>>, %arg9: memref<4x1xf32, #tpu.memory_space<vmem>>) attributes {dimension_semantics = [#tpu.dimension_semantics<arbitrary>, #tpu.dimension_semantics<arbitrary>], iteration_bounds = array<i64: 11, 4>, scalar_prefetch = 0 : i64, scratch_operands = 3 : i64, tpu.core_type = #tpu.core_type<tc>, window_params = [{transform_indices = @transform_0, window_bounds = array<i64: 1, 1>}, {transform_indices = @transform_1, window_bounds = array<i64: 64, 32>}, {pipeline_mode = #tpu.pipeline_mode<synchronous>, transform_indices = @transform_2, window_bounds = array<i64: 4, 32>}, {pipeline_mode = #tpu.pipeline_mode<synchronous>, transform_indices = @transform_3, window_bounds = array<i64: 4, 32>}, {transform_indices = @transform_4, window_bounds = array<i64: 64, 4>}]} {
    %c0_i32 = arith.constant 0 : i32
    %0 = arith.cmpi eq, %arg0, %c0_i32 : i32
    %c0_i32_0 = arith.constant 0 : i32
    %1 = arith.cmpi eq, %arg1, %c0_i32_0 : i32
    %2 = arith.andi %0, %1 : i1
    %3 = arith.extui %2 : i1 to i32
    %c0_i32_1 = arith.constant 0 : i32
    %4 = arith.cmpi ne, %3, %c0_i32_1 : i32
    scf.if %4 {
      %c0_32 = arith.constant 0 : index
      %c0_33 = arith.constant 0 : index
      %67 = vector.load %arg4[%c0_32, %c0_33] : memref<4x32xf32, #tpu.memory_space<vmem>>, vector<4x32xf32>
      %c0_34 = arith.constant 0 : index
      %c0_35 = arith.constant 0 : index
      %68 = vector.load %arg7[%c0_34, %c0_35] : memref<4x32xf32, #tpu.memory_space<vmem>>, vector<4x32xf32>
      tpu.vector_store %arg7[%c0_34, %c0_35], %67 {strides = array<i32>} : memref<4x32xf32, #tpu.memory_space<vmem>>, vector<4x32xf32>,
    } else {
    }
    %c0_i32_2 = arith.constant 0 : i32
    %5 = arith.cmpi eq, %arg1, %c0_i32_2 : i32
    %6 = arith.extui %5 : i1 to i32
    %c0_i32_3 = arith.constant 0 : i32
    %7 = arith.cmpi ne, %6, %c0_i32_3 : i32
    scf.if %7 {
      %cst_32 = arith.constant 0.000000e+00 : f32
      %67 = vector.broadcast %cst_32 : f32 to vector<4x32xf32>
      %c0_33 = arith.constant 0 : index
      %c0_34 = arith.constant 0 : index
      %68 = vector.load %arg8[%c0_33, %c0_34] : memref<4x32xf32, #tpu.memory_space<vmem>>, vector<4x32xf32>
      tpu.vector_store %arg8[%c0_33, %c0_34], %67 {strides = array<i32>} : memref<4x32xf32, #tpu.memory_space<vmem>>, vector<4x32xf32>,
      %cst_35 = arith.constant 0.000000e+00 : f32
      %69 = vector.broadcast %cst_35 : f32 to vector<4x1xf32>
      %c0_36 = arith.constant 0 : index
      %c0_37 = arith.constant 0 : index
      %70 = vector.load %arg9[%c0_36, %c0_37] : memref<4x1xf32, #tpu.memory_space<vmem>>, vector<4x1xf32>
      tpu.vector_store %arg9[%c0_36, %c0_37], %69 {strides = array<i32>} : memref<4x1xf32, #tpu.memory_space<vmem>>, vector<4x1xf32>,
    } else {
    }
    %c0 = arith.constant 0 : index
    %c0_4 = arith.constant 0 : index
    %8 = memref.load %arg2[%c0, %c0_4] : memref<1x1xf32, #tpu.memory_space<smem>>
    %c0_5 = arith.constant 0 : index
    %c0_6 = arith.constant 0 : index
    %9 = vector.load %arg3[%c0_5, %c0_6] : memref<64x32xf32, #tpu.memory_space<vmem>>, vector<64x32xf32>
    %10 = arith.mulf %9, %9 : vector<64x32xf32>
    %cst = arith.constant dense<0.000000e+00> : vector<64xf32>
    %11 = vector.multi_reduction <add>, %10, %cst [1] : vector<64x32xf32> to vector<64xf32>
    %12 = vector.shape_cast %11 : vector<64xf32> to vector<64x1xf32>
    %13 = math.sqrt %12 : vector<64x1xf32>
    %cst_7 = arith.constant 9.99999993E-9 : f32
    %14 = vector.broadcast %cst_7 : f32 to vector<64x1xf32>
    %15 = arith.maximumf %13, %14 : vector<64x1xf32>
    %16 = vector.broadcast %15 : vector<64x1xf32> to vector<64x32xf32>
    %17 = arith.divf %9, %16 : vector<64x32xf32>
    %c0_8 = arith.constant 0 : index
    %c0_9 = arith.constant 0 : index
    %18 = vector.load %arg7[%c0_8, %c0_9] : memref<4x32xf32, #tpu.memory_space<vmem>>, vector<4x32xf32>
    %19 = arith.mulf %18, %18 : vector<4x32xf32>
    %cst_10 = arith.constant dense<0.000000e+00> : vector<4xf32>
    %20 = vector.multi_reduction <add>, %19, %cst_10 [1] : vector<4x32xf32> to vector<4xf32>
    %21 = vector.shape_cast %20 : vector<4xf32> to vector<4x1xf32>
    %22 = math.sqrt %21 : vector<4x1xf32>
    %cst_11 = arith.constant 9.99999993E-9 : f32
    %23 = vector.broadcast %cst_11 : f32 to vector<4x1xf32>
    %24 = arith.maximumf %22, %23 : vector<4x1xf32>
    %25 = vector.broadcast %24 : vector<4x1xf32> to vector<4x32xf32>
    %26 = arith.divf %18, %25 : vector<4x32xf32>
    %cst_12 = arith.constant dense<0.000000e+00> : vector<64x4xf32>
    %27 = tpu.matmul %17, %26, %cst_12 {dimension_numbers = #tpu.dot_dimension_numbers<[1], [1], [0], [0], [0, 0, 1, 0], [], []>} : vector<64x32xf32>, vector<4x32xf32>, vector<64x4xf32> -> vector<64x4xf32>
    %28 = vector.broadcast %8 : f32 to vector<64x4xf32>
    %29 = arith.mulf %28, %27 : vector<64x4xf32>
    %cst_13 = arith.constant dense<0xFF800000> : vector<64xf32>
    %30 = vector.multi_reduction <maximumf>, %29, %cst_13 [1] : vector<64x4xf32> to vector<64xf32>
    %31 = vector.shape_cast %30 : vector<64xf32> to vector<64x1xf32>
    %32 = vector.broadcast %31 : vector<64x1xf32> to vector<64x4xf32>
    %33 = arith.subf %29, %32 : vector<64x4xf32>
    %34 = math.exp %33 : vector<64x4xf32>
    %cst_14 = arith.constant dense<0.000000e+00> : vector<64xf32>
    %35 = vector.multi_reduction <add>, %34, %cst_14 [1] : vector<64x4xf32> to vector<64xf32>
    %36 = vector.shape_cast %35 : vector<64xf32> to vector<64x1xf32>
    %37 = vector.broadcast %36 : vector<64x1xf32> to vector<64x4xf32>
    %38 = arith.divf %34, %37 : vector<64x4xf32>
    %39 = tpu.iota {dimensions = array<i32: 0>} : vector<64x1xi32>
    %c64_i32 = arith.constant 64 : i32
    %40 = arith.muli %arg1, %c64_i32 : i32
    %41 = vector.broadcast %40 : i32 to vector<64x1xi32>
    %42 = arith.addi %39, %41 : vector<64x1xi32>
    %c200_i32 = arith.constant 200 : i32
    %43 = vector.broadcast %c200_i32 : i32 to vector<64x1xi32>
    %44 = arith.cmpi slt, %42, %43 : vector<64x1xi32>
    %cst_15 = arith.constant 0.000000e+00 : f32
    %45 = vector.shape_cast %44 : vector<64x1xi1> to vector<64x1xi1>
    %46 = vector.broadcast %45 : vector<64x1xi1> to vector<64x4xi1>
    %47 = vector.broadcast %cst_15 : f32 to vector<64x4xf32>
    %48 = arith.select %46, %38, %47 : vector<64x4xi1>, vector<64x4xf32>
    %c0_16 = arith.constant 0 : index
    %c0_17 = arith.constant 0 : index
    %49 = vector.load %arg6[%c0_16, %c0_17] : memref<64x4xf32, #tpu.memory_space<vmem>>, vector<64x4xf32>
    tpu.vector_store %arg6[%c0_16, %c0_17], %48 {strides = array<i32>} : memref<64x4xf32, #tpu.memory_space<vmem>>, vector<64x4xf32>,
    %c0_18 = arith.constant 0 : index
    %c0_19 = arith.constant 0 : index
    %50 = vector.load %arg8[%c0_18, %c0_19] : memref<4x32xf32, #tpu.memory_space<vmem>>, vector<4x32xf32>
    %cst_20 = arith.constant dense<0.000000e+00> : vector<4x32xf32>
    %51 = tpu.matmul %48, %9, %cst_20 {dimension_numbers = #tpu.dot_dimension_numbers<[0], [0], [1], [1], [0, 1, 1, 1], [], []>} : vector<64x4xf32>, vector<64x32xf32>, vector<4x32xf32> -> vector<4x32xf32>
    %52 = arith.addf %50, %51 : vector<4x32xf32>
    %c0_21 = arith.constant 0 : index
    %c0_22 = arith.constant 0 : index
    %53 = vector.load %arg8[%c0_21, %c0_22] : memref<4x32xf32, #tpu.memory_space<vmem>>, vector<4x32xf32>
    tpu.vector_store %arg8[%c0_21, %c0_22], %52 {strides = array<i32>} : memref<4x32xf32, #tpu.memory_space<vmem>>, vector<4x32xf32>,
    %cst_23 = arith.constant 1.000000e+00 : f32
    %54 = vector.broadcast %cst_23 : f32 to vector<64x1xf32>
    %c0_24 = arith.constant 0 : index
    %c0_25 = arith.constant 0 : index
    %55 = vector.load %arg9[%c0_24, %c0_25] : memref<4x1xf32, #tpu.memory_space<vmem>>, vector<4x1xf32>
    %cst_26 = arith.constant dense<0.000000e+00> : vector<4x1xf32>
    %56 = tpu.matmul %48, %54, %cst_26 {dimension_numbers = #tpu.dot_dimension_numbers<[0], [0], [1], [1], [0, 1, 1, 1], [], []>} : vector<64x4xf32>, vector<64x1xf32>, vector<4x1xf32> -> vector<4x1xf32>
    %57 = arith.addf %55, %56 : vector<4x1xf32>
    %c0_27 = arith.constant 0 : index
    %c0_28 = arith.constant 0 : index
    %58 = vector.load %arg9[%c0_27, %c0_28] : memref<4x1xf32, #tpu.memory_space<vmem>>, vector<4x1xf32>
    tpu.vector_store %arg9[%c0_27, %c0_28], %57 {strides = array<i32>} : memref<4x1xf32, #tpu.memory_space<vmem>>, vector<4x1xf32>,
    %c3_i32 = arith.constant 3 : i32
    %59 = arith.cmpi eq, %arg1, %c3_i32 : i32
    %60 = arith.extui %59 : i1 to i32
    %c0_i32_29 = arith.constant 0 : i32
    %61 = arith.cmpi ne, %60, %c0_i32_29 : i32
    scf.if %61 {
      %c0_32 = arith.constant 0 : index
      %c0_33 = arith.constant 0 : index
      %67 = vector.load %arg8[%c0_32, %c0_33] : memref<4x32xf32, #tpu.memory_space<vmem>>, vector<4x32xf32>
      %c0_34 = arith.constant 0 : index
      %c0_35 = arith.constant 0 : index
      %68 = vector.load %arg9[%c0_34, %c0_35] : memref<4x1xf32, #tpu.memory_space<vmem>>, vector<4x1xf32>
      %69 = vector.broadcast %68 : vector<4x1xf32> to vector<4x32xf32>
      %70 = arith.divf %67, %69 : vector<4x32xf32>
      %c0_36 = arith.constant 0 : index
      %c0_37 = arith.constant 0 : index
      %71 = vector.load %arg7[%c0_36, %c0_37] : memref<4x32xf32, #tpu.memory_space<vmem>>, vector<4x32xf32>
      tpu.vector_store %arg7[%c0_36, %c0_37], %70 {strides = array<i32>} : memref<4x32xf32, #tpu.memory_space<vmem>>, vector<4x32xf32>,
    } else {
    }
    %c10_i32 = arith.constant 10 : i32
    %62 = arith.cmpi eq, %arg0, %c10_i32 : i32
    %c3_i32_30 = arith.constant 3 : i32
    %63 = arith.cmpi eq, %arg1, %c3_i32_30 : i32
    %64 = arith.andi %62, %63 : i1
    %65 = arith.extui %64 : i1 to i32
    %c0_i32_31 = arith.constant 0 : i32
    %66 = arith.cmpi ne, %65, %c0_i32_31 : i32
    scf.if %66 {
      %c0_32 = arith.constant 0 : index
      %c0_33 = arith.constant 0 : index
      %67 = vector.load %arg8[%c0_32, %c0_33] : memref<4x32xf32, #tpu.memory_space<vmem>>, vector<4x32xf32>
      %c0_34 = arith.constant 0 : index
      %c0_35 = arith.constant 0 : index
      %68 = vector.load %arg9[%c0_34, %c0_35] : memref<4x1xf32, #tpu.memory_space<vmem>>, vector<4x1xf32>
      %69 = vector.broadcast %68 : vector<4x1xf32> to vector<4x32xf32>
      %70 = arith.divf %67, %69 : vector<4x32xf32>
      %c0_36 = arith.constant 0 : index
      %c0_37 = arith.constant 0 : index
      %71 = vector.load %arg5[%c0_36, %c0_37] : memref<4x32xf32, #tpu.memory_space<vmem>>, vector<4x32xf32>
      tpu.vector_store %arg5[%c0_36, %c0_37], %70 {strides = array<i32>} : memref<4x32xf32, #tpu.memory_space<vmem>>, vector<4x32xf32>,
    } else {
    }
    return
  }
  func.func @transform_0(%arg0: i32, %arg1: i32) -> (i32, i32) {
    %c0_i32 = arith.constant 0 : i32
    %c0_i32_0 = arith.constant 0 : i32
    %c0_i32_1 = arith.constant 0 : i32
    return %c0_i32, %c0_i32_0 : i32, i32
  }
  func.func @transform_1(%arg0: i32, %arg1: i32) -> (i32, i32) {
    %c0_i32 = arith.constant 0 : i32
    %c0_i32_0 = arith.constant 0 : i32
    return %arg1, %c0_i32 : i32, i32
  }
  func.func @transform_2(%arg0: i32, %arg1: i32) -> (i32, i32) {
    %c0_i32 = arith.constant 0 : i32
    %c0_i32_0 = arith.constant 0 : i32
    %c0_i32_1 = arith.constant 0 : i32
    return %c0_i32, %c0_i32_0 : i32, i32
  }
  func.func @transform_3(%arg0: i32, %arg1: i32) -> (i32, i32) {
    %c0_i32 = arith.constant 0 : i32
    %c0_i32_0 = arith.constant 0 : i32
    %c0_i32_1 = arith.constant 0 : i32
    return %c0_i32, %c0_i32_0 : i32, i32
  }
  func.func @transform_4(%arg0: i32, %arg1: i32) -> (i32, i32) {
    %c0_i32 = arith.constant 0 : i32
    %c0_i32_0 = arith.constant 0 : i32
    return %arg1, %c0_i32 : i32, i32
  }
}

</mosaic_0001>

<bundles_post_ra>
// kernel: tpu_custom_call.1
= control target key start
LH: loop header
LB: loop body
LE: loop exit
PB: predicated region body
PF: predicated region fallthrough
CT: control target
= control target key end

     0   :  { %s1609_s0 = inlined_call_operand.<no memory space> [shape: f32[1,1], index: 0, kind: input, shape index: {}]   ;;  %s1610_s1 = inlined_call_operand.vmem [shape: f32[256,32], index: 1, kind: input, shape index: {}]   ;;  %s1611_s2 = inlined_call_operand.vmem [shape: f32[4,32], index: 2, kind: input, shape index: {}]   ;;  %s1612_s3 = inlined_call_operand.hbm [shape: f32[4,32], index: 3, kind: output, shape index: {0}]   ;;  %s1613_s4 = inlined_call_operand.vmem [shape: f32[256,4], index: 4, kind: output, shape index: {1}]  }
   0x1   :  { %10 = sst [smem:[#allocation5]] %s1609_s0 }
   0x2   :  { %11 = vsyncpa [#allocation7], 0  ;;  %s1320_s17 = smov 0   ;;  %s1322_s18 = smov 0  }
   0x3   :  { %s1324_s19 = smov 0   ;;  %s1326_s20 = smov 0  }
   0x4   :  { %s1328_s21 = smov 0  }
   0x5 LB: > { %s960_s0 = sadd.s32 4294967295, %s1282_s21   ;;  %s26_s22 = sadd.s32 1, %s1274_s19  ;;  %s1282_s21 = sphi %s1328_s21, %s17_s21   ;;  %s1278_s20 = sphi %s1326_s20, %s1618_s20   ;;  %s1274_s19 = sphi %s1324_s19, %s1617_s19   ;;  %s1270_s18 = sphi %s1322_s18, %s1616_s18   ;;  %s1266_s17 = sphi %s1320_s17, %s1615_s17  }
   0x6   : > { %p27_p0 = scmp.ge.s32.totalorder %s26_s22, 4  ;;  %s29_s23 = sadd.s32 1, %s1278_s20 }
   0x7   : > { %p964_p1 = scmp.ge.s32.totalorder %s1282_s21, 1  ;;  %p175_p2 = scmp.lt.s32.totalorder %s1282_s21, 45 }
   0x8   : > { %s1620_s22 = smov (%p27_p0, %s26_s22), 0  ;;  %s1622_s23 = smov (!%p27_p0, %s29_s23), %s1278_s20 }
   0x9   : > { %p176_p3 = pnand %p964_p1, %p175_p2  ;;  %p31_p4 = scmp.ge.s32.totalorder %s1622_s23, 11 }
   0xa   : > { %s965_s24 = sshll.u32 (!%p176_p3), %s1266_s17, 3  ;;  %p213_p5 = scmp.eq.s32.totalorder (!%p176_p3), %s1270_s18, 0 }
   0xb   : > { %s1624_s23 = smov (%p31_p4, %s1622_s23), 0  ;;  %179 = sbr.rel (%p176_p3) target bundleno = 1414 (0x586), region = 32 }
   0xc   : > { %p202_p6 = scmp.lt.s32.totalorder (!%p176_p3), %s965_s24, 31  ;;  %p214_p7 = scmp.eq.s32.totalorder (!%p176_p3), %s1266_s17, 0 }
   0xe   : > { %p215_p8 = pnand (!%p176_p3), %p214_p7, %p213_p5 }
  0x12   : > { %s1626_s24 = smov (!%p202_p6, %s965_s24), 31  ;;  %218 = sbr.rel (%p215_p8) target bundleno = 25 (0x19), region = 36 }
  0x13   : > { %s966_s25 = sshll.u32 %s1626_s24, 3  ;;  %v219_v0 = vld [vmem:[%s1611_s2] sm:$0xf] (!%p215_p8)  ;;  %vm220_vm0 = vcmask (!%p215_p8), 257024  }
  0x14   : > { %s1361_s28 = scalar_lea.vmem %s1610_s1, %s966_s25  ;;  %s1366_s5 = scalar_lea.vmem %s1613_s4, %s966_s25  ;;  %221 = vst.msk [vmem:[#allocation2] sm:$0xf] (!%p215_p8), %vm220_vm0, %v219_v0 }
  0x19 PF: > { %p969_p9 = scmp.ne.s32.totalorder %s1266_s17, 0 }
  0x1a   : > { %vm225_vm1 = vcmask (!%p969_p9), 257024   ;;  %vm227_vm2 = vcmask (!%p969_p9), 3072   ;;  %v1284_v1 = vmov (!%p969_p9), 0.0  }
  0x1b   : > { %224 = sbr.rel (%p969_p9) target bundleno = 34 (0x22), region = 40  ;;  %226 = vst.msk [vmem:[#allocation3] sm:$0xf] (!%p969_p9), %vm225_vm1, %v1284_v1 }
  0x1c   : > { %228 = vst.msk [vmem:[#allocation4] sm:$0xf] (!%p969_p9), %vm227_vm2, %v1284_v1 }
  0x22 PF: > { %v1372_v2 = vld [vmem:[#allocation2] sm:$0xf]  ;;  %vm353_vm3 = vcmask 257024   ;;  %v1375_v3 = vld [vmem:[%s1361_s28 + $0x8] sm:$0xff]  ;;  %vm246_vm4 = vcmask 261120   ;;  %v1378_v4 = vld [vmem:[%s1361_s28 + $0x10] sm:$0xff] }
  0x23   : > { %v352_v5 = vmul.f32 %v1372_v2, %v1372_v2  ;;  %v239_v6 = vmul.f32 %v1375_v3, %v1375_v3  ;;  %v240_v7 = vmul.f32 %v1378_v4, %v1378_v4  ;;  %v1387_v8 = vld [vmem:[%s1361_s28] sm:$0xff]  ;;  %v1395_v11 = vld [vmem:[%s1361_s28 + $0x18] sm:$0xff]  ;;  %v1406_v18 = vld [vmem:[%s1361_s28 + $0x28] sm:$0xff]  ;;  %s229_s8 = sld [smem:[#allocation5]]  ;;  %s979_s9 = sshll.u32 %s1266_s17, 6 }
  0x24   : > { %v238_v9 = vmul.f32 %v1387_v8, %v1387_v8  ;;  %v1392_v10 = vld [vmem:[%s1361_s28 + $0x20] sm:$0xff]  ;;  %v241_v17 = vmul.f32 %v1395_v11, %v1395_v11  ;;  %v1409_v19 = vld [vmem:[%s1361_s28 + $0x30] sm:$0xff]  ;;  %v243_v22 = vmul.f32 %v1406_v18, %v1406_v18  ;;  %v1418_v24 = vld [vmem:[%s1361_s28 + $0x38] sm:$0xff]  ;;  %p839_p10 = scmp.eq.s32.totalorder %s1266_s17, 3  ;;  %p982_p11 = scmp.ne.s32.totalorder %s1266_s17, 3 }
  0x25   : > { %v354_v12 = vsel %vm353_vm3, %v352_v5, 0.0  ;;  %v250_v13 = vsel %vm246_vm4, %v239_v6, 0.0  ;;  %v253_v14 = vsel %vm246_vm4, %v240_v7, 0.0  ;;  %v242_v16 = vmul.f32 %v1392_v10, %v1392_v10 }
  0x26   : > { %355 = vadd.xlane.f32.xlu0 %v354_v12  ;;  %251 = vadd.xlane.f32.xlu1 %v250_v13  ;;  %v247_v15 = vsel %vm246_vm4, %v238_v9, 0.0  ;;  %v256_v21 = vsel %vm246_vm4, %v241_v17, 0.0  ;;  %v244_v23 = vmul.f32 %v1409_v19, %v1409_v19  ;;  %v262_v25 = vsel %vm246_vm4, %v243_v22, 0.0 }
  0x27   : > { %v259_v20 = vsel %vm246_vm4, %v242_v16, 0.0  ;;  %v245_v27 = vmul.f32 %v1418_v24, %v1418_v24 }
  0x28   : > { %v265_v26 = vsel %vm246_vm4, %v244_v23, 0.0 }
  0x29   : > { %v268_v28 = vsel %vm246_vm4, %v245_v27, 0.0 }
  0x2a   : > { %254 = vadd.xlane.f32.xlu1 %v253_v14  ;;  %248 = vadd.xlane.f32.xlu0 %v247_v15 }
  0x2e   : > { %260 = vadd.xlane.f32.xlu1 %v259_v20  ;;  %257 = vadd.xlane.f32.xlu0 %v256_v21 }
  0x32   : > { %263 = vadd.xlane.f32.xlu0 %v262_v25  ;;  %266 = vadd.xlane.f32.xlu1 %v265_v26 }
  0x36   : > { %269 = vadd.xlane.f32.xlu0 %v268_v28 }
  0xb3   : > { %v356_v29 = vpop.xlane.xlu0 %355  ;;  %v252_v30 = vpop.xlane.xlu1 %251 }
  0xb4   : > { %1140 = vrsqrt.f32 %v356_v29  ;;  %vm359_vm5 = vcmp.eq.f32.partialorder %v356_v29, inf  ;;  %vm361_vm6 = vcmp.eq.f32.partialorder %v356_v29, 0.0  ;;  %v362_v38 = vand.u32 2147483648, %v356_v29 }
  0xb5   : > { %1142 = vrsqrt.f32 %v252_v30  ;;  %vm280_vm7 = vcmp.eq.f32.partialorder %v252_v30, inf  ;;  %vm282_vm8 = vcmp.eq.f32.partialorder %v252_v30, 0.0  ;;  %v283_v43 = vand.u32 2147483648, %v252_v30 }
  0xb7   : > { %v255_v31 = vpop.xlane.xlu1 %254  ;;  %v249_v32 = vpop.xlane.xlu0 %248 }
  0xb8   : > { %1144 = vrsqrt.f32 %v255_v31  ;;  %vm287_vm9 = vcmp.eq.f32.partialorder %v255_v31, inf  ;;  %vm289_vm10 = vcmp.eq.f32.partialorder %v255_v31, 0.0  ;;  %v290_v46 = vand.u32 2147483648, %v255_v31 }
  0xb9   : > { %1146 = vrsqrt.f32 %v249_v32  ;;  %vm273_vm11 = vcmp.eq.f32.partialorder %v249_v32, inf  ;;  %vm275_vm12 = vcmp.eq.f32.partialorder %v249_v32, 0.0  ;;  %v276_v56 = vand.u32 2147483648, %v249_v32 }
  0xbb   : > { %v261_v33 = vpop.xlane.xlu1 %260  ;;  %v1425_v34 = vpop.xlane.xlu0 %257 }
  0xbc   : > { %1148 = vrsqrt.f32 %v261_v33  ;;  %vm301_vm13 = vcmp.eq.f32.partialorder %v261_v33, inf  ;;  %vm303_vm14 = vcmp.eq.f32.partialorder %v261_v33, 0.0  ;;  %v304_v60 = vand.u32 2147483648, %v261_v33 }
  0xbd   : > { %1150 = vrsqrt.f32 %v1425_v34  ;;  %vm294_vm15 = vcmp.eq.f32.partialorder %v1425_v34, inf  ;;  %vm296_vm0 = vcmp.eq.f32.partialorder %v1425_v34, 0.0  ;;  %v297_v7 = vand.u32 2147483648, %v1425_v34 }
  0xbe   : > { %v1141_v35 = vpop.eup %1140 }
  0xbf   : > { %v1143_v36 = vpop.eup %1142  ;;  %v358_v37 = vmul.f32 %v1141_v35, %v356_v29  ;;  %v1428_v39 = vpop.xlane.xlu0 %263 }
  0xc0   : > { %v1430_v40 = vpop.xlane.xlu1 %266  ;;  %v279_v41 = vmul.f32 %v1143_v36, %v252_v30  ;;  %1152 = vrsqrt.f32 %v1428_v39  ;;  %vm308_vm1 = vcmp.eq.f32.partialorder %v1428_v39, inf  ;;  %v311_v22 = vand.u32 2147483648, %v1428_v39 }
  0xc1   : > { %v360_v42 = vsel %vm359_vm5, %v356_v29, %v358_v37  ;;  %1154 = vrsqrt.f32 %v1430_v40  ;;  %vm315_vm2 = vcmp.eq.f32.partialorder %v1430_v40, inf  ;;  %v318_v20 = vand.u32 2147483648, %v1430_v40 }
  0xc2   : > { %v1145_v44 = vpop.eup %1144  ;;  %v281_v45 = vsel %vm280_vm7, %v252_v30, %v279_v41  ;;  %v363_v47 = vsel %vm361_vm6, %v362_v38, %v360_v42  ;;  %vm317_vm5 = vcmp.eq.f32.partialorder %v1430_v40, 0.0  ;;  %vm310_vm6 = vcmp.eq.f32.partialorder %v1428_v39, 0.0 }
  0xc3   : > { %v1147_v48 = vpop.eup %1146  ;;  %v284_v49 = vsel %vm282_vm8, %v283_v43, %v281_v45  ;;  %v286_v50 = vmul.f32 %v1145_v44, %v255_v31  ;;  %v1435_v51 = vpop.xlane.xlu0 %269  ;;  %v364_v52 = vmax.f32 %v363_v47, 1e-08 }
  0xc4   : > { %v328_v53 = vmax.f32 %v284_v49, 1e-08  ;;  %v272_v54 = vmul.f32 %v1147_v48, %v249_v32  ;;  %1156 = vrsqrt.f32 %v1435_v51  ;;  %vm322_vm7 = vcmp.eq.f32.partialorder %v1435_v51, inf }
  0xc5   : > { %v288_v55 = vsel %vm287_vm9, %v255_v31, %v286_v50  ;;  %1158 = vrcp.f32 %v364_v52  ;;  %v325_v29 = vand.u32 2147483648, %v1435_v51  ;;  %vm324_vm8 = vcmp.eq.f32.partialorder %v1435_v51, 0.0 }
  0xc6   : > { %v1149_v57 = vpop.eup %1148  ;;  %v291_v58 = vsel %vm289_vm10, %v290_v46, %v288_v55  ;;  %v274_v59 = vsel %vm273_vm11, %v249_v32, %v272_v54  ;;  %1160 = vrcp.f32 %v328_v53  ;;  %v499_v54 = vstv %s229_s8 }
  0xc7   : > { %v1151_v61 = vpop.eup %1150  ;;  %v329_v62 = vmax.f32 %v291_v58, 1e-08  ;;  %v300_v63 = vmul.f32 %v1149_v57, %v261_v33  ;;  %v277_v0 = vsel %vm275_vm12, %v276_v56, %v274_v59  ;;  %vm508_vm9 = vcmask 31744  }
  0xc8   : > { %v293_v1 = vmul.f32 %v1151_v61, %v1425_v34  ;;  %v327_v5 = vmax.f32 %v277_v0, 1e-08 }
  0xc9   : > { %1162 = vrcp.f32 %v329_v62  ;;  %v302_v6 = vsel %vm301_vm13, %v261_v33, %v300_v63 }
  0xca   : > { %v1153_v9 = vpop.eup %1152  ;;  %v305_v12 = vsel %vm303_vm14, %v304_v60, %v302_v6  ;;  %v295_v13 = vsel %vm294_vm15, %v1425_v34, %v293_v1  ;;  %1164 = vrcp.f32 %v327_v5 }
  0xcb   : > { %v1155_v14 = vpop.eup %1154  ;;  %v331_v15 = vmax.f32 %v305_v12, 1e-08  ;;  %v298_v16 = vsel %vm296_vm0, %v297_v7, %v295_v13  ;;  %v307_v17 = vmul.f32 %v1153_v9, %v1428_v39 }
  0xcc   : > { %v330_v21 = vmax.f32 %v298_v16, 1e-08  ;;  %v314_v23 = vmul.f32 %v1155_v14, %v1430_v40 }
  0xcd   : > { %1166 = vrcp.f32 %v331_v15  ;;  %v309_v25 = vsel %vm308_vm1, %v1428_v39, %v307_v17 }
  0xce   : > { %v1157_v26 = vpop.eup %1156  ;;  %1168 = vrcp.f32 %v330_v21  ;;  %v312_v27 = vsel %vm310_vm6, %v311_v22, %v309_v25  ;;  %v316_v28 = vsel %vm315_vm2, %v1430_v40, %v314_v23  ;;  %vm689_vm2 = vcmask 523264  }
  0xcf   : > { %v1159_v30 = vpop.eup %1158  ;;  %v332_v31 = vmax.f32 %v312_v27, 1e-08  ;;  %v319_v32 = vsel %vm317_vm5, %v318_v20, %v316_v28  ;;  %v321_v33 = vmul.f32 %v1157_v26, %v1435_v51  ;;  %vm837_vm5 = vcmask 3072  }
  0xd0   : > { %v333_v34 = vmax.f32 %v319_v32, 1e-08  ;;  %v366_v35 = vmul.f32 %v1159_v30, %v1372_v2  ;;  %v1161_v37 = vpop.eup %1160 }
  0xd1   : > { %1170 = vrcp.f32 %v332_v31  ;;  %v323_v36 = vsel %vm322_vm7, %v1435_v51, %v321_v33  ;;  %v338_v43 = vmul.f32 %v1161_v37, %v1375_v3 }
  0xd2   : > { %1172 = vrcp.f32 %v333_v34  ;;  %v326_v38 = vsel %vm324_vm8, %v325_v29, %v323_v36  ;;  %1014 = vmatprep.subr.msk.mxu0 %vm246_vm4, %v366_v35 }
  0xd3   : > { %v1163_v39 = vpop.eup %1162  ;;  %v334_v40 = vmax.f32 %v326_v38, 1e-08  ;;  %1015 = vmatpush3.xpose.msk.msra.mxu0 %vm246_vm4, %v366_v35 }
  0xd4   : > { %v1165_v41 = vpop.eup %1164  ;;  %v340_v2 = vmul.f32 %v1163_v39, %v1378_v4 }
  0xd5   : > { %1174 = vrcp.f32 %v334_v40  ;;  %v336_v42 = vmul.f32 %v1165_v41, %v1387_v8 }
  0xd7   : > { %v1167_v44 = vpop.eup %1166  ;;  %1016 = vmatprep.mubr.msk.f32.mxu0 %vm246_vm4, %v336_v42 }
  0xd8   : > { %v1169_v45 = vpop.eup %1168  ;;  %1017 = vmatmul.mubr.msk.f32.vlgmr.msra.gmra.mrb[0].mxu0 %vm246_vm4, %v338_v43  ;;  %v344_v48 = vmul.f32 %v1167_v44, %v1392_v10 }
  0xd9   : > { %1019 = vmatprep.mubr.msk.f32.mxu0 %vm246_vm4, %v340_v2  ;;  %v342_v46 = vmul.f32 %v1169_v45, %v1395_v11 }
  0xdb   : > { %v1171_v47 = vpop.eup %1170 }
  0xdc   : > { %v1173_v49 = vpop.eup %1172  ;;  %1020 = vmatmul.mubr.msk.f32.gmra.mrb[2].mxu0 %vm246_vm4, %v342_v46  ;;  %v346_v50 = vmul.f32 %v1171_v47, %v1406_v18 }
  0xdd   : > { %1022 = vmatprep.mubr.msk.f32.mxu0 %vm246_vm4, %v344_v48  ;;  %v348_v51 = vmul.f32 %v1173_v49, %v1409_v19 }
  0xdf   : > { %v1175_v52 = vpop.eup %1174 }
  0xe0   : > { %1023 = vmatmul.mubr.msk.f32.gmra.mrb[4].mxu0 %vm246_vm4, %v346_v50  ;;  %v350_v53 = vmul.f32 %v1175_v52, %v1418_v24 }
  0xe1   : > { %1025 = vmatprep.mubr.msk.f32.mxu0 %vm246_vm4, %v348_v51 }
  0xe4   : > { %1026 = vmatmul.mubr.msk.f32.gmra.mrb[6].mxu0 %vm246_vm4, %v350_v53  ;;  %vm1287_vm4 = vmmov 0  }
 0x1ab   : > { %v1018_v55 = vpop.f32.mrb[0].mxu0 }
 0x1ac   : > { %v501_v56 = vmul.f32 %v1018_v55, %v499_v54  ;;  %v460_v57 = vpop.f32.mrb[1].mxu0 }
 0x1ad   : > { %v500_v58 = vmul.f32 %v499_v54, %v460_v57 }
 0x1ae   : > { %v512_v59 = vsel %vm508_vm9, %v501_v56, -inf }
 0x1af   : > { %v1021_v60 = vpop.f32.mrb[2].mxu0  ;;  %513 = vmax.xlane.f32.xlu0 %v512_v59  ;;  %v509_v61 = vsel %vm508_vm9, %v500_v58, -inf }
 0x1b0   : > { %v503_v62 = vmul.f32 %v1021_v60, %v499_v54  ;;  %v470_v63 = vpop.f32.mrb[3].mxu0  ;;  %510 = vmax.xlane.f32.xlu1 %v509_v61 }
 0x1b1   : > { %v502_v0 = vmul.f32 %v499_v54, %v470_v63  ;;  %v1067_v63 = vpack.c.bf16 %v1375_v3, %v1387_v8  ;;  %v1073_v3 = vpack.c.bf16 %v1406_v18, %v1392_v10  ;;  %v1076_v8 = vpack.c.bf16 %v1418_v24, %v1409_v19 }
 0x1b2   : > { %v518_v1 = vsel %vm508_vm9, %v503_v62, -inf  ;;  %v607_v18 = vstv %s979_s9 }
 0x1b3   : > { %v1024_v5 = vpop.f32.mrb[4].mxu0  ;;  %519 = vmax.xlane.f32.xlu0 %v518_v1  ;;  %v515_v6 = vsel %vm508_vm9, %v502_v0, -inf  ;;  %v1286_v1 = vmov 1.0|1.0  }
 0x1b4   : > { %v505_v7 = vmul.f32 %v1024_v5, %v499_v54  ;;  %v480_v9 = vpop.f32.mrb[5].mxu0  ;;  %516 = vmax.xlane.f32.xlu1 %v515_v6  ;;  %v1070_v5 = vpack.c.bf16 %v1395_v11, %v1378_v4  ;;  %v1288_v6 = vmov 0.0   ;;  %v597_v4 = vlaneseq }
 0x1b5   : > { %v504_v12 = vmul.f32 %v499_v54, %v480_v9  ;;  %1044 = vmatprep.mubr.msk.f32.mxu1 %vm1287_vm4, %v1288_v6  ;;  %1063 = vmatprep.mubr.msk.f32.mxu0 %vm1287_vm4, %v1288_v6 }
 0x1b6   : > { %v524_v13 = vsel %vm508_vm9, %v505_v7, -inf  ;;  %v598_v11 = vshrl.u32 %v597_v4, 7 }
 0x1b7   : > { %v1027_v14 = vpop.f32.mrb[6].mxu0  ;;  %525 = vmax.xlane.f32.xlu0 %v524_v13  ;;  %v521_v15 = vsel %vm508_vm9, %v504_v12, -inf }
 0x1b8   : > { %v507_v16 = vmul.f32 %v1027_v14, %v499_v54  ;;  %v490_v17 = vpop.f32.mrb[7].mxu0  ;;  %522 = vmax.xlane.f32.xlu1 %v521_v15  ;;  %v601_v15 = vadd.s32 24, %v598_v11  ;;  %v608_v24 = vadd.s32 %v607_v18, %v598_v11 }
 0x1b9   : > { %v506_v20 = vmul.f32 %v499_v54, %v490_v17 }
 0x1ba   : > { %v530_v21 = vsel %vm508_vm9, %v507_v16, -inf  ;;  %vm616_vm11 = vcmp.lt.s32.totalorder %v608_v24, 200 }
 0x1bb   : > { %531 = vmax.xlane.f32.xlu0 %v530_v21  ;;  %v527_v22 = vsel %vm508_vm9, %v506_v20, -inf  ;;  %v611_v21 = vadd.s32 %v607_v18, %v601_v15 }
 0x1bc   : > { %528 = vmax.xlane.f32.xlu1 %v527_v22  ;;  %v603_v22 = vadd.s32 40, %v598_v11 }
 0x1bd   : > { %vm619_vm12 = vcmp.lt.s32.totalorder %v611_v21, 200 }
 0x23c   : > { %v514_v23 = vpop.xlane.xlu0 %513 }
 0x23d   : > { %v534_v25 = vsub.f32 %v501_v56, %v514_v23  ;;  %v511_v26 = vpop.xlane.xlu1 %510 }
 0x23e   : > { %v533_v27 = vsub.f32 %v500_v58, %v511_v26 }
 0x23f   : > { %v543_v28 = vmul.f32 1.442695, %v534_v25 }
 0x240   : > { %v541_v29 = vmul.f32 1.442695, %v533_v27  ;;  %v520_v30 = vpop.xlane.xlu0 %519 }
 0x241   : > { %1176 = vpow2.f32 %v543_v28  ;;  %v536_v31 = vsub.f32 %v503_v62, %v520_v30  ;;  %v517_v32 = vpop.xlane.xlu1 %516  ;;  %v602_v28 = vadd.s32 32, %v598_v11 }
 0x242   : > { %1178 = vpow2.f32 %v541_v29  ;;  %v535_v33 = vsub.f32 %v502_v0, %v517_v32  ;;  %v1285_v0 = vmov 0.0|0.0  }
 0x243   : > { %v547_v34 = vmul.f32 1.442695, %v536_v31  ;;  %1078 = vmatprep.subr.bf16.mxu0 %v1285_v0  ;;  %1066 = vmatprep.subr.bf16.mxu1 %v1285_v0 }
 0x244   : > { %v545_v35 = vmul.f32 1.442695, %v535_v33  ;;  %v526_v36 = vpop.xlane.xlu0 %525  ;;  %1079 = vmatpush3.bf16.msra.mxu0 %v1286_v1  ;;  %1068 = vmatpush3.bf16.msra.mxu1 %v1067_v63 }
 0x245   : > { %1180 = vpow2.f32 %v547_v34  ;;  %v538_v37 = vsub.f32 %v505_v7, %v526_v36  ;;  %v523_v38 = vpop.xlane.xlu1 %522  ;;  %1080 = vmatprep.subr.bf16.mxu0 %v1285_v0  ;;  %1069 = vmatprep.subr.bf16.mxu1 %v1285_v0  ;;  %v613_v34 = vadd.s32 %v607_v18, %v603_v22 }
 0x246   : > { %1182 = vpow2.f32 %v545_v35  ;;  %v537_v39 = vsub.f32 %v504_v12, %v523_v38  ;;  %v599_v12 = vadd.s32 8, %v598_v11  ;;  %v605_v35 = vadd.s32 56, %v598_v11 }
 0x247   : > { %v551_v40 = vmul.f32 1.442695, %v538_v37  ;;  %v612_v38 = vadd.s32 %v607_v18, %v602_v28  ;;  %vm621_vm14 = vcmp.lt.s32.totalorder %v613_v34, 200 }
 0x248   : > { %v549_v41 = vmul.f32 1.442695, %v537_v39  ;;  %v532_v42 = vpop.xlane.xlu0 %531  ;;  %1081 = vmatpush3.bf16.msra.mxu0 %v1286_v1  ;;  %1071 = vmatpush3.bf16.msra.mxu1 %v1070_v5  ;;  %v609_v14 = vadd.s32 %v607_v18, %v599_v12  ;;  %v604_v39 = vadd.s32 48, %v598_v11  ;;  %v1289_v5 = vmov (!%p982_p11), 0  }
 0x249   : > { %1184 = vpow2.f32 %v551_v40  ;;  %v540_v43 = vsub.f32 %v507_v16, %v532_v42  ;;  %v529_v44 = vpop.xlane.xlu1 %528  ;;  %1082 = vmatprep.subr.bf16.mxu0 %v1285_v0  ;;  %1072 = vmatprep.subr.bf16.mxu1 %v1285_v0  ;;  %v600_v16 = vadd.s32 16, %v598_v11  ;;  %vm620_vm15 = vcmp.lt.s32.totalorder %v612_v38, 200 }
 0x24a   : > { %1186 = vpow2.f32 %v549_v41  ;;  %v539_v2 = vsub.f32 %v506_v20, %v529_v44  ;;  %vm617_vm10 = vcmp.lt.s32.totalorder %v609_v14, 200  ;;  %v615_v44 = vadd.s32 %v607_v18, %v605_v35  ;;  %1208 = vset.pattern.permute.xlu0 (!%p982_p11), %v1289_v5 }
 0x24b   : > { %v1493_v45 = vpop.eup %1176  ;;  %v555_v46 = vmul.f32 1.442695, %v540_v43  ;;  %v610_v27 = vadd.s32 %v607_v18, %v600_v16 }
 0x24c   : > { %v1495_v47 = vpop.eup %1178  ;;  %v553_v48 = vmul.f32 1.442695, %v539_v2  ;;  %v560_v49 = vsel %vm508_vm9, %v1493_v45, 0.0  ;;  %1083 = vmatpush3.bf16.msra.mxu0 %v1286_v1  ;;  %1074 = vmatpush3.bf16.msra.mxu1 %v1073_v3  ;;  %vm623_vm0 = vcmp.lt.s32.totalorder %v615_v44, 200 }
 0x24d   : > { %1188 = vpow2.f32 %v555_v46  ;;  %561 = vadd.xlane.f32.xlu0 %v560_v49  ;;  %v557_v50 = vsel %vm508_vm9, %v1495_v47, 0.0  ;;  %1084 = vmatprep.subr.bf16.mxu0 %v1285_v0  ;;  %vm618_vm13 = vcmp.lt.s32.totalorder %v610_v27, 200  ;;  %v614_v46 = vadd.s32 %v607_v18, %v604_v39 }
 0x24e   : > { %1190 = vpow2.f32 %v553_v48  ;;  %558 = vadd.xlane.f32.xlu1 %v557_v50  ;;  %1075 = vmatprep.subr.bf16.mxu1 %v1285_v0 }
 0x24f   : > { %v1501_v51 = vpop.eup %1180  ;;  %vm622_vm1 = vcmp.lt.s32.totalorder %v614_v46, 200 }
 0x250   : > { %v1503_v52 = vpop.eup %1182  ;;  %v566_v53 = vsel %vm508_vm9, %v1501_v51, 0.0  ;;  %1085 = vmatpush3.bf16.msra.mxu0 %v1286_v1  ;;  %1077 = vmatpush3.bf16.msra.mxu1 %v1076_v8 }
 0x251   : > { %567 = vadd.xlane.f32.xlu0 %v566_v53  ;;  %v563_v54 = vsel %vm508_vm9, %v1503_v52, 0.0 }
 0x252   : > { %564 = vadd.xlane.f32.xlu1 %v563_v54 }
 0x253   : > { %v1509_v55 = vpop.eup %1184 }
 0x254   : > { %v1511_v56 = vpop.eup %1186  ;;  %v572_v57 = vsel %vm508_vm9, %v1509_v55, 0.0 }
 0x255   : > { %573 = vadd.xlane.f32.xlu0 %v572_v57  ;;  %v569_v58 = vsel %vm508_vm9, %v1511_v56, 0.0  ;;  %v656_v57 = vld [vmem:[#allocation3] sm:$0xf] }
 0x256   : > { %570 = vadd.xlane.f32.xlu1 %v569_v58  ;;  %v765_v58 = vld [vmem:[#allocation4] sm:$0xf] }
 0x257   : > { %v1517_v59 = vpop.eup %1188 }
 0x258   : > { %v1519_v60 = vpop.eup %1190  ;;  %v578_v61 = vsel %vm508_vm9, %v1517_v59, 0.0 }
 0x259   : > { %579 = vadd.xlane.f32.xlu0 %v578_v61  ;;  %v575_v62 = vsel %vm508_vm9, %v1519_v60, 0.0 }
 0x25a   : > { %576 = vadd.xlane.f32.xlu1 %v575_v62 }
 0x2da   : > { %v562_v7 = vpop.xlane.xlu0 %561 }
 0x2db   : > { %1192 = vrcp.f32 %v562_v7  ;;  %v559_v9 = vpop.xlane.xlu1 %558 }
 0x2dc   : > { %1194 = vrcp.f32 %v559_v9 }
 0x2de   : > { %v568_v10 = vpop.xlane.xlu0 %567 }
 0x2df   : > { %1196 = vrcp.f32 %v568_v10  ;;  %v565_v13 = vpop.xlane.xlu1 %564 }
 0x2e0   : > { %1198 = vrcp.f32 %v565_v13 }
 0x2e2   : > { %v574_v19 = vpop.xlane.xlu0 %573 }
 0x2e3   : > { %1200 = vrcp.f32 %v574_v19  ;;  %v571_v17 = vpop.xlane.xlu1 %570 }
 0x2e4   : > { %1202 = vrcp.f32 %v571_v17 }
 0x2e5   : > { %v1193_v20 = vpop.eup %1192 }
 0x2e6   : > { %v1195_v23 = vpop.eup %1194  ;;  %v580_v25 = vpop.xlane.xlu0 %579  ;;  %v584_v26 = vmul.f32 %v1193_v20, %v1493_v45 }
 0x2e7   : > { %1204 = vrcp.f32 %v580_v25  ;;  %v577_v29 = vpop.xlane.xlu1 %576  ;;  %v582_v30 = vmul.f32 %v1195_v23, %v1495_v47 }
 0x2e8   : > { %1206 = vrcp.f32 %v577_v29  ;;  %v641_v31 = vsel %vm617_vm10, %v584_v26, 0.0 }
 0x2e9   : > { %v1197_v32 = vpop.eup %1196  ;;  %v640_v33 = vsel %vm616_vm11, %v582_v30, 0.0  ;;  %649 = vst.msk [vmem:[%s1366_s5 + $0x8] sm:$0xff] %vm508_vm9, %v641_v31 }
 0x2ea   : > { %v1199_v36 = vpop.eup %1198  ;;  %657 = vxpose.xlu1.b32.start [1/8] (short) (narrow) %v640_v33, 8  ;;  %648 = vst.msk [vmem:[%s1366_s5] sm:$0xff] %vm508_vm9, %v640_v33  ;;  %v588_v37 = vmul.f32 %v1197_v32, %v1501_v51 }
 0x2eb   : > { %v586_v40 = vmul.f32 %v1199_v36, %v1503_v52 }
 0x2ec   : > { %v643_v41 = vsel %vm619_vm12, %v588_v37, 0.0 }
 0x2ed   : > { %v1201_v42 = vpop.eup %1200  ;;  %v642_v43 = vsel %vm618_vm13, %v586_v40, 0.0  ;;  %651 = vst.msk [vmem:[%s1366_s5 + $0x18] sm:$0xff] %vm508_vm9, %v643_v41 }
 0x2ee   : > { %v1203_v2 = vpop.eup %1202  ;;  %658 = vxpose.xlu1.b32.cont [2/8] (short) (narrow) %v641_v31, 8  ;;  %650 = vst.msk [vmem:[%s1366_s5 + $0x10] sm:$0xff] %vm508_vm9, %v642_v43  ;;  %v592_v45 = vmul.f32 %v1201_v42, %v1509_v55 }
 0x2ef   : > { %v590_v47 = vmul.f32 %v1203_v2, %v1511_v56 }
 0x2f0   : > { %v645_v48 = vsel %vm621_vm14, %v592_v45, 0.0 }
 0x2f1   : > { %v1205_v49 = vpop.eup %1204  ;;  %v644_v50 = vsel %vm620_vm15, %v590_v47, 0.0  ;;  %653 = vst.msk [vmem:[%s1366_s5 + $0x28] sm:$0xff] %vm508_vm9, %v645_v48 }
 0x2f2   : > { %v1207_v51 = vpop.eup %1206  ;;  %659 = vxpose.xlu1.b32.cont [3/8] (short) (narrow) %v642_v43, 8  ;;  %652 = vst.msk [vmem:[%s1366_s5 + $0x20] sm:$0xff] %vm508_vm9, %v644_v50  ;;  %v596_v52 = vmul.f32 %v1205_v49, %v1517_v59 }
 0x2f3   : > { %v594_v53 = vmul.f32 %v1207_v51, %v1519_v60 }
 0x2f4   : > { %v647_v54 = vsel %vm623_vm0, %v596_v52, 0.0 }
 0x2f5   : > { %v646_v55 = vsel %vm622_vm1, %v594_v53, 0.0  ;;  %655 = vst.msk [vmem:[%s1366_s5 + $0x38] sm:$0xff] %vm508_vm9, %v647_v54 }
 0x2f6   : > { %660 = vxpose.xlu1.b32.cont [4/8] (short) (narrow) %v643_v41, 8  ;;  %654 = vst.msk [vmem:[%s1366_s5 + $0x30] sm:$0xff] %vm508_vm9, %v646_v55 }
 0x2fa   : > { %661 = vxpose.xlu1.b32.cont [5/8] (short) (narrow) %v644_v50, 8 }
 0x2fe   : > { %662 = vxpose.xlu1.b32.cont [6/8] (short) (narrow) %v645_v48, 8 }
 0x302   : > { %663 = vxpose.xlu1.b32.cont [7/8] (short) (narrow) %v646_v55, 8 }
 0x306   : > { %664 = vxpose.xlu1.b32.end [8/8] (short) (narrow) %v647_v54, 8 }
 0x36a   : > { %v673_v56 = vpop.trf.xlu1 }
 0x36b   : > { %1045 = vmatmul.mubr.msk.f32.vlgmr.msra.gmra.mrb[0].mxu1 %vm689_vm2, %v673_v56  ;;  %1064 = vmatmul.mubr.msk.f32.vlgmr.msra.gmra.mrb[8].mxu0 %vm689_vm2, %v673_v56 }
 0x43c   : > { %842 = sbr.rel (%p982_p11) target bundleno = 1240 (0x4d8), region = 44 }
 0x43e   : > { %v759_v59 = vpop.f32.mrb[0].mxu1  ;;  %v832_v60 = vpop.f32.mrb[8].mxu0 }
 0x43f   : > { %v763_v61 = vadd.f32 %v759_v59, %v656_v57  ;;  %v836_v62 = vadd.f32 %v832_v60, %v765_v58  ;;  %v1046_v63 = vpop.f32.mrb[1].mxu1  ;;  %v1065_v0 = vpop.f32.mrb[9].mxu0 }
 0x441   : > { %764 = vst.msk [vmem:[#allocation3] sm:$0xf] %vm353_vm3, %v763_v61 }
 0x442   : > { %838 = vst.msk [vmem:[#allocation4] sm:$0xf] %vm837_vm5, %v836_v62 }
 0x448   : > { %v843_v3 = vld [vmem:[#allocation3] sm:$0xf] }
 0x449   : > { %v844_v1 = vld [vmem:[#allocation4] sm:$0xf] }
 0x44a   : > { %847 = vperm.xlu0 %1208, %v844_v1  }
 0x4c9   : > { %v848_v6 = vpop.permute.xlu0 %847 }
 0x4ca   : > { %1209 = vrcp.f32 %v848_v6 }
 0x4d4   : > { %v1210_v8 = vpop.eup %1209 }
 0x4d5   : > { %v851_v4 = vmul.f32 %v1210_v8, %v843_v3 }
 0x4d7   : > { %852 = vst.msk [vmem:[#allocation2] sm:$0xf] %vm353_vm3, %v851_v4 }
 0x4d8 PF: > { %p853_p12 = scmp.eq.s32.totalorder %s1270_s18, 10 }
 0x4da   : > { %p854_p13 = pnand %p853_p12, %p839_p10 }
 0x4db   : > { %v1290_v7 = vmov (!%p854_p13), 0  }
 0x4dc   : > { %857 = sbr.rel (%p854_p13) target bundleno = 1389 (0x56d), region = 48  ;;  %1211 = vset.pattern.permute.xlu0 (!%p854_p13), %v1290_v7 }
 0x4dd   : > { %v858_v12 = vld [vmem:[#allocation3] sm:$0xf] (!%p854_p13) }
 0x4de   : > { %v859_v11 = vld [vmem:[#allocation4] sm:$0xf] (!%p854_p13) }
 0x4df   : > { %862 = vperm.xlu0 (!%p854_p13), %1211, %v859_v11  }
 0x55e   : > { %v863_v9 = vpop.permute.xlu0 %862 }
 0x55f   : > { %1212 = vrcp.f32 %v863_v9 }
 0x569   : > { %v1213_v10 = vpop.eup %1212 }
 0x56a   : > { %v866_v18 = vmul.f32 %v1213_v10, %v858_v12 }
 0x56c   : > { %867 = vst.msk [vmem:[#allocation6] sm:$0xf] %vm353_vm3, %v866_v18 }
 0x56d PF: > { %p1568_p0 = scmp.eq.s32.totalorder %s960_s0, 43  ;;  %s1291_s11 = smov [#allocation6]  }
 0x56e   : > { %s880_s12 = sshll.u32 %s1291_s11, 4  ;;  %s881_s12 = int_to_ptr.vmem [resolvable:$true] %s880_s12 }
 0x56f   : > { %s1214_s13 = scalar_lea.vmem %s881_s12, 64  ;;  %p1221_p4 = scmp.lt.s32.totalorder %s881_s12, %s881_s12 }
 0x570   : > { %p1215_p1 = scmp.ne.s32.totalorder %s881_s12, %s1214_s13  ;;  %p1222_p5 = scmp.lt.s32.totalorder %s1214_s13, %s1214_s13 }
 0x572   : > { %p1216_p2 = pnand %p1215_p1, %p1568_p0  ;;  %p1223_p6 = por %p1222_p5, %p1221_p4 }
 0x574   : > { %p1217_p3 = pneg %p1216_p2 }
 0x576   : > { %p1224_p7 = pnand %p1223_p6, %p1217_p3 }
 0x578   : > { %1227 = shalt.err (!%p1224_p7)
}
 0x579   : > { %s1228_s16 = scalar_lea.hbm %s1612_s3, 64 }
 0x57a   : > { %p1229_p8 = scmp.ne.s32.totalorder %s1612_s3, %s1228_s16  ;;  %p1234_p11 = scmp.lt.u32.totalorder %s1228_s16, %s1612_s3 }
 0x57c   : > { %p1230_p9 = pnand %p1229_p8, %p1568_p0 }
 0x57e   : > { %p1231_p10 = pneg %p1230_p9 }
 0x580   : > { %p1236_p12 = pnand %p1234_p11, %p1231_p10 }
 0x582   : > { %1239 = shalt.err (!%p1236_p12)
}
 0x583   : > { %1087 = dma.vmem_to_hbm [thread:$0]  (%p1568_p0), %s881_s12, 64, %s1612_s3, [#allocation7]  }
 0x584   : > { %1261 = dma.done.wait (%p1568_p0), [#allocation7], 64  }
 0x585   : > { %1263 = vsyncadd (%p1568_p0), [#allocation7], 4294967232 }
 0x586 PF: > { %s17_s21 = sadd.s32 1, %s1282_s21   ;;  %s1615_s17 = smov %s1274_s19 }
 0x587   : > { %p14_p13 = scmp.ge.s32.totalorder %s17_s21, 46   ;;  %s1616_s18 = smov %s1278_s20 }
 0x588   : > { %s1617_s19 = smov %s1620_s22  ;;  %s1618_s20 = smov %s1624_s23 }
 0x589   :  { %16 = sbr.rel (!%p14_p13) target bundleno = 5 (0x5), region = 87 }
 0x590   :  { %905 = vsyncpa [#allocation7], 1 }
 0x591   :  { %907 = vsyncpa [#allocation7 + $0x1], 1 }

</bundles_post_ra>
